<compile_context>
chip_gen: v5e
topology: v5e:2x2
jax: 0.10.0
libtpu: 0.0.40
codegen_flags: <defaults>
</compile_context>

<pallas_src>
import jax
import jax.numpy as jnp
from jax.experimental import pallas as pl
from jax.experimental.pallas import tpu as pltpu

IN_FEATURES = 100
OUT_FEATURES = 100
DEFAULT_BLOCK_B = 4096     # batch tile: multiple of 8, fits default scoped VMEM everywhere


def generator_kernel(x_ref, w_ref, b_ref, o_ref):
    # Hot path: MXU matmul, VPU bias add, EUP tanh — one batch tile per step.
    x = x_ref[...]                      # [tb, 100]   (streamed, double-buffered)
    w = w_ref[...]                      # [100, 100]  (resident across grid steps)
    b = b_ref[...]                      # [1, 100]    (resident across grid steps)
    y = jnp.dot(x, w,
                preferred_element_type=jnp.float32,
                precision=jax.lax.Precision.HIGHEST) + b
    o_ref[...] = jnp.tanh(y).astype(o_ref.dtype)


def _round_up_8(n):
    return ((n + 7) // 8) * 8


def generator_forward(x, w_t, b, *, block_b=DEFAULT_BLOCK_B):
    """x: [B, 100] f32, w_t: [100, 100] f32 (= W.T), b: [100] f32 -> [B, 100] f32."""
    B = x.shape[0]
    b2d = b.reshape(1, OUT_FEATURES)

    # Batch tile: multiple of 8, bounded by block_b; for B >= 16 cap it so the
    # grid has at least 2 steps (so the "parallel" axis can shard across the
    # two TensorCores on v7x). Ragged final blocks are handled by Pallas.
    if B >= 16:
        tb = min(block_b, _round_up_8(pl.cdiv(B, 2)))
    else:
        tb = _round_up_8(max(B, 1))
    tb = max(8, _round_up_8(tb))
    grid = (pl.cdiv(B, tb),)

    return pl.pallas_call(
        generator_kernel,
        out_shape=jax.ShapeDtypeStruct((B, OUT_FEATURES), jnp.float32),
        grid_spec=pltpu.PrefetchScalarGridSpec(
            num_scalar_prefetch=0,
            grid=grid,
            in_specs=[
                # streamed: new batch tile each step (double-buffered by Pallas)
                pl.BlockSpec((tb, IN_FEATURES), lambda i: (i, 0)),
                # resident: same weight / bias block every step
                pl.BlockSpec((IN_FEATURES, OUT_FEATURES), lambda i: (0, 0)),
                pl.BlockSpec((1, OUT_FEATURES), lambda i: (0, 0)),
            ],
            out_specs=pl.BlockSpec((tb, OUT_FEATURES), lambda i: (i, 0)),
        ),
        compiler_params=pltpu.CompilerParams(
            # independent batch tiles -> shard across TCs on v7x (no-op on v5e/v6e)
            dimension_semantics=("parallel",),
        ),
    )(x, w_t, b2d)


if __name__ == "__main__":
    key = jax.random.PRNGKey(0)
    k_x, k_w, k_b = jax.random.split(key, 3)

    # Small demo shapes; batch=20 -> tb=16, a 2-step grid with a ragged final
    # tile, exercising the implicit OOB handling and the 2-TC split path.
    batch = 20
    x = jax.random.normal(k_x, (batch, IN_FEATURES), dtype=jnp.float32)

    # Deterministic "init": emulate nn.Linear default U(-1/sqrt(in), 1/sqrt(in)).
    bound = 1.0 / jnp.sqrt(jnp.float32(IN_FEATURES))
    w = jax.random.uniform(k_w, (OUT_FEATURES, IN_FEATURES),
                           minval=-bound, maxval=bound, dtype=jnp.float32)
    b = jax.random.uniform(k_b, (OUT_FEATURES,),
                           minval=-bound, maxval=bound, dtype=jnp.float32)

    out = generator_forward(x, w.T, b)
    jax.block_until_ready(out)

    # Cross-check against a plain-JAX reference of the PyTorch forward
    # (HIGHEST precision so both sides use true-f32 matmuls).
    ref = jnp.tanh(
        jnp.dot(x, w.T, precision=jax.lax.Precision.HIGHEST) + b)
    assert out.shape == (batch, OUT_FEATURES)
    assert jnp.allclose(out, ref, atol=1e-5, rtol=1e-5)

    print("KERNEL_OK")
</pallas_src>

<mosaic_0001>
module attributes {stable_mosaic.version = 11 : i64} {
  func.func @generator_kernel(%arg0: i32, %arg1: memref<16x100xf32, #tpu.memory_space<vmem>>, %arg2: memref<100x100xf32, #tpu.memory_space<vmem>>, %arg3: memref<1x100xf32, #tpu.memory_space<vmem>>, %arg4: memref<16x100xf32, #tpu.memory_space<vmem>>) attributes {dimension_semantics = [#tpu.dimension_semantics<parallel>], iteration_bounds = array<i64: 2>, scalar_prefetch = 0 : i64, scratch_operands = 0 : i64, tpu.core_type = #tpu.core_type<tc>, window_params = [{transform_indices = @transform_0, window_bounds = array<i64: 16, 100>}, {pipeline_mode = #tpu.pipeline_mode<synchronous>, transform_indices = @transform_1, window_bounds = array<i64: 100, 100>}, {pipeline_mode = #tpu.pipeline_mode<synchronous>, transform_indices = @transform_2, window_bounds = array<i64: 1, 100>}, {transform_indices = @transform_3, window_bounds = array<i64: 16, 100>}]} {
    %c0 = arith.constant 0 : index
    %c0_0 = arith.constant 0 : index
    %0 = vector.load %arg1[%c0, %c0_0] : memref<16x100xf32, #tpu.memory_space<vmem>>, vector<16x100xf32>
    %c0_1 = arith.constant 0 : index
    %c0_2 = arith.constant 0 : index
    %1 = vector.load %arg2[%c0_1, %c0_2] : memref<100x100xf32, #tpu.memory_space<vmem>>, vector<100x100xf32>
    %c0_3 = arith.constant 0 : index
    %c0_4 = arith.constant 0 : index
    %2 = vector.load %arg3[%c0_3, %c0_4] : memref<1x100xf32, #tpu.memory_space<vmem>>, vector<1x100xf32>
    %cst = arith.constant dense<0.000000e+00> : vector<16x100xf32>
    %3 = tpu.matmul %0, %1, %cst {dimension_numbers = #tpu.dot_dimension_numbers<[1], [0], [0], [1], [0, 0, 1, 1], [], []>, precision = #tpu.contract_precision<fp32>} : vector<16x100xf32>, vector<100x100xf32>, vector<16x100xf32> -> vector<16x100xf32>
    %4 = vector.broadcast %2 : vector<1x100xf32> to vector<16x100xf32>
    %5 = arith.addf %3, %4 : vector<16x100xf32>
    %6 = math.tanh %5 : vector<16x100xf32>
    %c0_5 = arith.constant 0 : index
    %c0_6 = arith.constant 0 : index
    %7 = vector.load %arg4[%c0_5, %c0_6] : memref<16x100xf32, #tpu.memory_space<vmem>>, vector<16x100xf32>
    tpu.vector_store %arg4[%c0_5, %c0_6], %6 {strides = array<i32>} : memref<16x100xf32, #tpu.memory_space<vmem>>, vector<16x100xf32>,
    return
  }
  func.func @transform_0(%arg0: i32) -> (i32, i32) {
    %c0_i32 = arith.constant 0 : i32
    %c0_i32_0 = arith.constant 0 : i32
    return %arg0, %c0_i32 : i32, i32
  }
  func.func @transform_1(%arg0: i32) -> (i32, i32) {
    %c0_i32 = arith.constant 0 : i32
    %c0_i32_0 = arith.constant 0 : i32
    %c0_i32_1 = arith.constant 0 : i32
    return %c0_i32, %c0_i32_0 : i32, i32
  }
  func.func @transform_2(%arg0: i32) -> (i32, i32) {
    %c0_i32 = arith.constant 0 : i32
    %c0_i32_0 = arith.constant 0 : i32
    %c0_i32_1 = arith.constant 0 : i32
    return %c0_i32, %c0_i32_0 : i32, i32
  }
  func.func @transform_3(%arg0: i32) -> (i32, i32) {
    %c0_i32 = arith.constant 0 : i32
    %c0_i32_0 = arith.constant 0 : i32
    return %arg0, %c0_i32 : i32, i32
  }
}

</mosaic_0001>

<bundles_post_ra>
// kernel: tpu_custom_call.1
= control target key start
LH: loop header
LB: loop body
LE: loop exit
PB: predicated region body
PF: predicated region fallthrough
CT: control target
= control target key end

     0   :  { %8 = vsyncpa [#allocation3], 0  ;;  %s1373_s0 = inlined_call_operand.hbm [shape: f32[20,100], index: 0, kind: input, shape index: {}]   ;;  %s1374_s1 = inlined_call_operand.hbm [shape: f32[100,100], index: 1, kind: input, shape index: {}]   ;;  %s1375_s2 = inlined_call_operand.vmem [shape: f32[1,100], index: 2, kind: input, shape index: {}]   ;;  %s1376_s3 = inlined_call_operand.hbm [shape: f32[20,100], index: 3, kind: output, shape index: {}]  }
   0x1   :  { %10 = vsyncpa [#allocation3 + $0x1], 0 }
   0x2   :  { %11 = vsyncpa [#allocation6], 0 }
   0x3   :  { %12 = vsyncpa [#allocation4], 0 }
   0x4   :  { %14 = vsyncpa [#allocation4 + $0x1], 0  ;;  %s992_s12 = smov 0   ;;  %s994_s13 = smov 0  }
   0x5   :  { %s996_s14 = smov 0   ;;  %s998_s15 = smov 0  }
   0x6 LB: > { %s1013_s16 = sadd.s32 4294967295, %s961_s15   ;;  %s698_s17 = sadd.s32 4294967294, %s961_s15   ;;  %s961_s15 = sphi %s998_s15, %s1393_s15   ;;  %s957_s14 = sphi %s996_s14, %s1392_s14   ;;  %s953_s13 = sphi %s994_s13, %s1391_s13   ;;  %s949_s12 = sphi %s992_s12, %s1390_s12  }
   0x7   : > { %s1017_s18 = sadd.s32 1, %s961_s15   ;;  %s27_s19 = sadd.s32 1, %s957_s14 }
   0x8   : > { %s24_s20 = ssub.s32 %s961_s15, %s1017_s18  ;;  %p34_p0 = scmp.ne.s32.totalorder %s957_s14, %s953_s13 }
   0x9   : > { %p25_p1 = scmp.eq.s32.totalorder %s24_s20, 0  ;;  %p35_p2 = scmp.eq.s32.totalorder %s961_s15, 0 }
   0xa   : > { %p40_p3 = scmp.ne.s32.totalorder %s953_s13, %s949_s12  ;;  %p1378_p4 = scmp.eq.s32.totalorder %s1013_s16, 0 }
   0xb   : > { %s1029_s21 = scalar_select %p25_p1, %s957_s14, %s27_s19  }
   0xc   : > { %p1031_p5 = por %p35_p2, %p34_p0  ;;  %p1037_p6 = por %p1378_p4, %p40_p3 }
   0xd   : > { %p106_p7 = scmp.eq.s32.totalorder %s1013_s16, 1  ;;  %p112_p8 = scmp.eq.s32.totalorder %s698_s17, 1 }
   0xe   : > { %p699_p9 = scmp.ge.s32.totalorder %s961_s15, 1  ;;  %p119_p10 = scmp.lt.s32.totalorder %s961_s15, 3 }
   0xf   : > { %p1044_p11 = por %p106_p7, %p34_p0  ;;  %p1048_p12 = por %p112_p8, %p40_p3 }
  0x10   : > { %p1052_p13 = pnand %p699_p9, %p119_p10  ;;  %s130_s29 = sshll.u32 %s1374_s1, 4  ;;  %s131_s29 = int_to_ptr.hbm [resolvable:$true] %s130_s29 }
  0x11   : > { %s1382_s25 = scalar_select %p1048_p12, 1, 0 }
  0x12   : > { %p756_p1 = pneg %p1052_p13  ;;  %s963_s30 = smov [#allocation5]  }
  0x13   : > { %s132_s4 = sshll.u32 %s963_s30, 4  ;;  %s964_s5 = smov 128   ;;  %s133_s4 = int_to_ptr.vmem [resolvable:$true] %s132_s4 }
  0x14   : > { %p757_p0 = pnand %p756_p1, %p1378_p4  ;;  %s965_s6 = smov 8  }
  0x15   : > { %p1377_p2 = scmp.ge.s32.totalorder %s961_s15, 2 }
  0x16   : > { %759 = dma.hbm_to_vmem [thread:$0]  (!%p757_p0), %s131_s29, 1664, %s133_s4, [#allocation6], %s964_s5, %s964_s5, %s965_s6  }
  0x17   : > { %145 = sbr.rel (%p1377_p2) target bundleno = 64 (0x40), region = 24 }
  0x1c   : > { %148 = sbr.rel (!%p1031_p5) target bundleno = 64 (0x40), region = 28  ;;  %s149_s7 = sand.u32 (%p1031_p5), 1, %s957_s14  }
  0x1d   : > { %s703_s8 = sshll.u32 (%p1031_p5), %s961_s15, 1  ;;  %s702_s9 = sshll.u32 (%p1031_p5), %s149_s7, 4 }
  0x1e   : > { %s155_s10 = ssub.s32 (%p1031_p5), 3, %s703_s8  ;;  %s1073_s20 = scalar_lea.sflag (%p1031_p5), [#allocation3], %s149_s7 }
  0x1f   : > { %p156_p3 = scmp.lt.s32.totalorder (%p1031_p5), %s155_s10, 2  ;;  %s153_s27 = scalar_lea.vmem (%p1031_p5), [#allocation2], %s702_s9 }
  0x21   : > { %s1395_s10 = smov (!%p156_p3, %s155_s10), 2 }
  0x22   : > { %s704_s11 = sshll.u32 %s1395_s10, 3 }
  0x23   : > { %s159_s17 = ssub.s32 16, %s704_s11 }
  0x24   : > { %s160_s19 = sshll.u32 %s159_s17, 4 }
  0x25   : > { %161 = vsyncadd %s1073_s20, %s160_s19  ;;  %p1076_p5 = scmp.ne.s32.totalorder %s704_s11, 0  ;;  %s722_s28 = sshll.u32 %s961_s15, 4 }
  0x26   : > { %s164_s4 = scalar_lea.hbm %s1373_s0, %s722_s28  ;;  %s1084_s5 = sshll.u32 %s153_s27, 4  ;;  %s169_s5 = int_to_ptr.vmem [resolvable:$true] %s1084_s5 }
  0x27   : > { %s166_s6 = sshll.u32 %s164_s4, 4  ;;  %s708_s7 = sshll.u32 %s1395_s10, 7  ;;  %s1087_s6 = int_to_ptr.hbm [resolvable:$true] %s166_s6 }
  0x28   : > { %s841_s8 = sshra.s32 %s1087_s6, 4  ;;  %s843_s9 = sshrl.u32 %s708_s7, 4  ;;  %s842_s8 = int_to_ptr.hbm [resolvable:$true] %s841_s8 }
  0x29   : > { %s848_s11 = scalar_lea.hbm %s842_s8, %s843_s9  ;;  %s852_s27 = scalar_lea.hbm %s1373_s0, 24 }
  0x2a   : > { %p849_p7 = scmp.ne.s32.totalorder %s842_s8, %s848_s11  ;;  %p853_p10 = scmp.lt.s32.totalorder %s842_s8, %s1373_s0 }
  0x2b   : > { %p854_p1 = scmp.lt.s32.totalorder %s852_s27, %s848_s11 }
  0x2c   : > { %p850_p8 = pnand %p849_p7, %p1076_p5 }
  0x2d   : > { %p855_p0 = por %p854_p1, %p853_p10 }
  0x2e   : > { %p851_p9 = pneg %p850_p8 }
  0x30   : > { %p856_p3 = pnand %p855_p0, %p851_p9 }
  0x32   : > { %859 = shalt.err (!%p856_p3)
}
  0x33   : > { %s860_s30 = sshra.s32 %s169_s5, 4  ;;  %s966_s17 = smov [#allocation2]   ;;  %s861_s30 = int_to_ptr.vmem [resolvable:$true] %s860_s30 }
  0x34   : > { %s867_s4 = scalar_lea.vmem %s861_s30, %s843_s9  ;;  %s871_s19 = scalar_lea.vmem %s966_s17, 32 }
  0x35   : > { %p868_p7 = scmp.ne.s32.totalorder %s861_s30, %s867_s4  ;;  %p873_p4 = scmp.lt.s32.totalorder %s871_s19, %s867_s4 }
  0x37   : > { %p869_p8 = pnand %p868_p7, %p1076_p5 }
  0x39   : > { %p870_p2 = pneg %p869_p8 }
  0x3b   : > { %p875_p12 = pnand %p873_p4, %p870_p2 }
  0x3d   : > { %878 = shalt.err (!%p875_p12)
}
  0x3e   : > { %s967_s8 = smov 128   ;;  %s968_s11 = smov 8  }
  0x3f   : > { %174 = dma.hbm_to_vmem [thread:$0]  (%p1076_p5), %s1087_s6, %s708_s7, %s169_s5, %s1073_s20, %s967_s8, %s967_s8, %s968_s11  }
  0x40 PF: > { %180 = sbr.rel (%p1052_p13) target bundleno = 309 (0x135), region = 32  ;;  %s1116_s9 = sand.u32 (!%p1052_p13), 1, %s953_s13  }
  0x41   : > { %s710_s27 = sshll.u32 (!%p1052_p13), %s1116_s9, 4  ;;  %s183_s28 = scalar_lea.sflag (!%p1052_p13), [#allocation3], %s1116_s9 }
  0x42   : > { %s1122_s29 = scalar_lea.vmem (!%p1052_p13), [#allocation2], %s710_s27 }
  0x45   : > { %936 = dma.done.wait (%p1037_p6), %s183_s28, 256  }
  0x46   : > { %938 = vsyncadd (%p1037_p6), %s183_s28, 4294967040  ;;  %p1385_p4 = scmp.eq.s32.totalorder %s1013_s16, 0 }
  0x48   : > { %940 = dma.done.wait (%p1385_p4), [#allocation6], 1664   ;;  %p1386_p12 = pmov %p1385_p4 }
  0x49   : > { %vm251_vm0 = vcmask 1043456   ;;  %v239_v0 = vld [vmem:[#allocation5 + $0x60] sm:$0xf]  ;;  %v238_v1 = vld [vmem:[#allocation5 + $0x58] sm:$0xff]  ;;  %v237_v2 = vld [vmem:[#allocation5 + $0x50] sm:$0xff]  ;;  %vm244_vm1 = vcmask 818176  }
  0x4a   : > { %942 = vsyncadd (%p1386_p12), [#allocation6], 4294965632  ;;  %v253_v3 = vsel %vm251_vm0, %v239_v0, 0  ;;  %v1132_v4 = vand.u32 4294901760, %v238_v1  ;;  %v1134_v5 = vand.u32 4294901760, %v237_v2  ;;  %v236_v6 = vld [vmem:[#allocation5 + $0x48] sm:$0xff] }
  0x4b   : > { %v235_v7 = vld [vmem:[#allocation5 + $0x40] sm:$0xff]  ;;  %v234_v8 = vld [vmem:[#allocation5 + $0x38] sm:$0xff]  ;;  %v1136_v9 = vand.u32 4294901760, %v253_v3  ;;  %v1138_v10 = vand.u32 4294901760, %v236_v6  ;;  %v233_v13 = vld [vmem:[#allocation5 + $0x30] sm:$0xff]  ;;  %s214_s10 = scalar_lea.vmem [#allocation7], %s710_s27 }
  0x4c   : > { %v1140_v11 = vand.u32 4294901760, %v235_v7  ;;  %v1142_v12 = vand.u32 4294901760, %v234_v8  ;;  %v232_v14 = vld [vmem:[#allocation5 + $0x28] sm:$0xff]  ;;  %v311_v15 = vsub.f32 %v238_v1, %v1132_v4  ;;  %v317_v16 = vsub.f32 %v237_v2, %v1134_v5  ;;  %v231_v25 = vld [vmem:[#allocation5 + $0x20] sm:$0xff]  ;;  %v230_v31 = vld [vmem:[#allocation5 + $0x18] sm:$0xff]  ;;  %s593_s20 = scalar_lea.sflag [#allocation4], %s1116_s9 }
  0x4d   : > { %v1146_v17 = vand.u32 4294901760, %v233_v13  ;;  %259 = vmatpush.msra.mxu0 %v1136_v9  ;;  %v305_v18 = vsub.f32 %v253_v3, %v1136_v9  ;;  %448 = vmatpush.msra.mxu3 %v1136_v9  ;;  %v323_v19 = vsub.f32 %v236_v6, %v1138_v10  ;;  %v1158_v24 = vand.u32 4294901760, %v232_v14  ;;  %v229_v37 = vld [vmem:[#allocation5 + $0x10] sm:$0xff]  ;;  %v228_v44 = vld [vmem:[#allocation5 + $0x8] sm:$0xff]  ;;  %v227_v49 = vld [vmem:[#allocation5] sm:$0xff]  ;;  %s714_s22 = sshll.u32 (%p1044_p11), %s1013_s16, 1 }
  0x4e   : > { %v329_v20 = vsub.f32 %v235_v7, %v1140_v11  ;;  %v1153_v21 = vand.u32 4294901760, %v311_v15  ;;  %v1155_v22 = vand.u32 4294901760, %v317_v16  ;;  %v335_v23 = vsub.f32 %v234_v8, %v1142_v12  ;;  %v225_v50 = vld [vmem:[%s1122_s29] sm:$0xff]  ;;  %s601_s5 = ssub.s32 (%p1044_p11), 3, %s714_s22 }
  0x4f   : > { %261 = vmatpush.msra.mxu0 %v1132_v4  ;;  %396 = vmatpush.msra.mxu2 %v305_v18  ;;  %v1161_v26 = vand.u32 4294901760, %v305_v18  ;;  %v1163_v27 = vand.u32 4294901760, %v323_v19  ;;  %v341_v29 = vsub.f32 %v233_v13, %v1146_v17  ;;  %v1173_v34 = vand.u32 4294901760, %v231_v25  ;;  %p602_p6 = scmp.lt.s32.totalorder (%p1044_p11), %s601_s5, 2 }
  0x50   : > { %450 = vmatpush.msra.mxu3 %v1132_v4  ;;  %v313_v28 = vsub.f32 %v311_v15, %v1153_v21  ;;  %v1168_v30 = vand.u32 4294901760, %v329_v20  ;;  %v319_v33 = vsub.f32 %v317_v16, %v1155_v22  ;;  %v347_v35 = vsub.f32 %v232_v14, %v1158_v24 }
  0x51   : > { %263 = vmatpush.msra.mxu0 %v1134_v5  ;;  %399 = vmatpush.msra.mxu2 %v311_v15  ;;  %v307_v32 = vsub.f32 %v305_v18, %v1161_v26  ;;  %v1177_v36 = vand.u32 4294901760, %v335_v23  ;;  %v325_v40 = vsub.f32 %v323_v19, %v1163_v27  ;;  %v1181_v41 = vand.u32 4294901760, %v230_v31 }
  0x52   : > { %452 = vmatpush.msra.mxu3 %v1134_v5  ;;  %v314_v39 = vand.u32 4294901760, %v313_v28  ;;  %v331_v42 = vsub.f32 %v329_v20, %v1168_v30  ;;  %v1185_v43 = vand.u32 4294901760, %v341_v29  ;;  %v320_v45 = vand.u32 4294901760, %v319_v33 }
  0x53   : > { %265 = vmatpush.msra.mxu0 %v1138_v10  ;;  %402 = vmatpush.msra.mxu2 %v317_v16  ;;  %v308_v38 = vand.u32 4294901760, %v307_v32  ;;  %v353_v46 = vsub.f32 %v231_v25, %v1173_v34  ;;  %v1189_v47 = vand.u32 4294901760, %v229_v37  ;;  %v337_v48 = vsub.f32 %v335_v23, %v1177_v36  ;;  %v226_v16 = vld [vmem:[%s1122_s29 + $0x8] sm:$0xff] }
  0x54   : > { %454 = vmatpush.msra.mxu3 %v1138_v10  ;;  %v326_v51 = vand.u32 4294901760, %v325_v40  ;;  %v359_v52 = vsub.f32 %v230_v31, %v1181_v41  ;;  %v1196_v53 = vand.u32 4294901760, %v228_v44  ;;  %v1198_v54 = vand.u32 4294901760, %v347_v35 }
  0x55   : > { %267 = vmatpush.msra.mxu0 %v1140_v11  ;;  %309 = vmatpush.msra.mxu1 %v308_v38  ;;  %v332_v55 = vand.u32 4294901760, %v331_v42  ;;  %v343_v56 = vsub.f32 %v341_v29, %v1185_v43  ;;  %v365_v57 = vsub.f32 %v229_v37, %v1189_v47  ;;  %v1204_v58 = vand.u32 4294901760, %v227_v49 }
  0x56   : > { %405 = vmatpush.msra.mxu2 %v323_v19  ;;  %456 = vmatpush.msra.mxu3 %v1140_v11  ;;  %v1206_v59 = vand.u32 4294901760, %v353_v46  ;;  %v246_v60 = vsel %vm244_vm1, %v225_v50, 0  ;;  %v338_v61 = vand.u32 4294901760, %v337_v48  ;;  %v349_v62 = vsub.f32 %v347_v35, %v1198_v54 }
  0x57   : > { %269 = vmatpush.msra.mxu0 %v1142_v12  ;;  %315 = vmatpush.msra.mxu1 %v314_v39  ;;  %v371_v63 = vsub.f32 %v228_v44, %v1196_v53  ;;  %v1213_v0 = vand.u32 4294901760, %v359_v52  ;;  %v1216_v1 = vand.u32 4294901760, %v246_v60  ;;  %v344_v2 = vand.u32 4294901760, %v343_v56 }
  0x58   : > { %408 = vmatpush.msra.mxu2 %v329_v20  ;;  %458 = vmatpush.msra.mxu3 %v1142_v12  ;;  %v355_v3 = vsub.f32 %v353_v46, %v1206_v59  ;;  %v377_v6 = vsub.f32 %v227_v49, %v1204_v58  ;;  %v1221_v7 = vand.u32 4294901760, %v365_v57  ;;  %v350_v8 = vand.u32 4294901760, %v349_v62 }
  0x59   : > { %271 = vmatpush.msra.mxu0 %v1146_v17  ;;  %321 = vmatpush.msra.mxu1 %v320_v45  ;;  %v361_v13 = vsub.f32 %v359_v52, %v1213_v0  ;;  %v1226_v14 = vand.u32 4294901760, %v371_v63  ;;  %v285_v15 = vsub.f32 %v246_v60, %v1216_v1  ;;  %v249_v28 = vsel %vm244_vm1, %v226_v16, 0 }
  0x5a   : > { %411 = vmatpush.msra.mxu2 %v335_v23  ;;  %460 = vmatpush.msra.mxu3 %v1146_v17  ;;  %v356_v18 = vand.u32 4294901760, %v355_v3  ;;  %v367_v19 = vsub.f32 %v365_v57, %v1221_v7  ;;  %v1233_v20 = vand.u32 4294901760, %v377_v6  ;;  %v1243_v33 = vand.u32 4294901760, %v249_v28 }
  0x5b   : > { %273 = vmatpush.msra.mxu0 %v1158_v24  ;;  %327 = vmatpush.msra.mxu1 %v326_v51  ;;  %v362_v23 = vand.u32 4294901760, %v361_v13  ;;  %v373_v25 = vsub.f32 %v371_v63, %v1226_v14 }
  0x5c   : > { %414 = vmatpush.msra.mxu2 %v341_v29  ;;  %462 = vmatpush.msra.mxu3 %v1158_v24  ;;  %v286_v29 = vand.u32 4294901760, %v285_v15  ;;  %v368_v31 = vand.u32 4294901760, %v367_v19  ;;  %v379_v32 = vsub.f32 %v377_v6, %v1233_v20  ;;  %v293_v39 = vsub.f32 %v249_v28, %v1243_v33 }
  0x5d   : > { %275 = vmatpush.msra.mxu0 %v1173_v34  ;;  %333 = vmatpush.msra.mxu1 %v332_v55 }
  0x5e   : > { %417 = vmatpush.msra.mxu2 %v347_v35  ;;  %464 = vmatpush.msra.mxu3 %v1173_v34  ;;  %v374_v35 = vand.u32 4294901760, %v373_v25  ;;  %v287_v37 = vsub.f32 %v285_v15, %v286_v29  ;;  %v380_v38 = vand.u32 4294901760, %v379_v32 }
  0x5f   : > { %277 = vmatpush.msra.mxu0 %v1181_v41  ;;  %339 = vmatpush.msra.mxu1 %v338_v61 }
  0x60   : > { %420 = vmatpush.msra.mxu2 %v353_v46  ;;  %466 = vmatpush.msra.mxu3 %v1181_v41  ;;  %v288_v40 = vand.u32 4294901760, %v287_v37 }
  0x61   : > { %279 = vmatpush.msra.mxu0 %v1189_v47  ;;  %345 = vmatpush.msra.mxu1 %v344_v2 }
  0x62   : > { %423 = vmatpush.msra.mxu2 %v359_v52  ;;  %468 = vmatpush.msra.mxu3 %v1189_v47 }
  0x63   : > { %281 = vmatpush.msra.mxu0 %v1196_v53  ;;  %351 = vmatpush.msra.mxu1 %v350_v8 }
  0x64   : > { %426 = vmatpush.msra.mxu2 %v365_v57  ;;  %470 = vmatpush.msra.mxu3 %v1196_v53 }
  0x65   : > { %283 = vmatpush.msra.mxu0 %v1204_v58  ;;  %357 = vmatpush.msra.mxu1 %v356_v18 }
  0x66   : > { %429 = vmatpush.msra.mxu2 %v371_v63  ;;  %472 = vmatpush.msra.mxu3 %v1204_v58 }
  0x67   : > { %492 = vmatpush.msrb.mxu0 %v1161_v26  ;;  %363 = vmatpush.msra.mxu1 %v362_v23 }
  0x68   : > { %432 = vmatpush.msra.mxu2 %v377_v6  ;;  %737 = vmatpush.msrb.mxu3 %v1136_v9 }
  0x69   : > { %496 = vmatpush.msrb.mxu0 %v1153_v21  ;;  %369 = vmatpush.msra.mxu1 %v368_v31 }
  0x6a   : > { %724 = vmatpush.msrb.mxu2 %v1161_v26  ;;  %738 = vmatpush.msrb.mxu3 %v1132_v4  ;;  %v294_v26 = vand.u32 4294901760, %v293_v39 }
  0x6b   : > { %500 = vmatpush.msrb.mxu0 %v1155_v22  ;;  %375 = vmatpush.msra.mxu1 %v374_v35 }
  0x6c   : > { %725 = vmatpush.msrb.mxu2 %v1153_v21  ;;  %739 = vmatpush.msrb.mxu3 %v1134_v5  ;;  %v295_v21 = vsub.f32 %v293_v39, %v294_v26 }
  0x6d   : > { %504 = vmatpush.msrb.mxu0 %v1163_v27  ;;  %381 = vmatpush.msra.mxu1 %v380_v38 }
  0x6e   : > { %726 = vmatpush.msrb.mxu2 %v1155_v22  ;;  %289 = vmatmul.f32.vlgmr.msra.gmra.mxu0 %v288_v40 }
  0x6f   : > { %508 = vmatpush.msrb.mxu0 %v1168_v30  ;;  %554 = vmatpush.msrb.mxu1 %v1136_v9 }
  0x70   : > { %727 = vmatpush.msrb.mxu2 %v1163_v27  ;;  %740 = vmatpush.msrb.mxu3 %v1138_v10 }
  0x71   : > { %556 = vmatpush.msrb.mxu1 %v1132_v4  ;;  %512 = vmatpush.msrb.mxu0 %v1177_v36  ;;  %v296_v4 = vand.u32 4294901760, %v295_v21 }
  0x72   : > { %728 = vmatpush.msrb.mxu2 %v1168_v30  ;;  %741 = vmatpush.msrb.mxu3 %v1140_v11 }
  0x73   : > { %435 = vmatmul.f32.vlgmr.msra.gmra.mxu2 %v285_v15  ;;  %516 = vmatpush.msrb.mxu0 %v1185_v43 }
  0x74   : > { %729 = vmatpush.msrb.mxu2 %v1177_v36  ;;  %558 = vmatpush.msrb.mxu1 %v1134_v5 }
  0x75   : > { %476 = vmatmul.f32.vlgmr.msra.gmra.mxu3 %v286_v29  ;;  %520 = vmatpush.msrb.mxu0 %v1198_v54 }
  0x76   : > { %730 = vmatpush.msrb.mxu2 %v1185_v43  ;;  %560 = vmatpush.msrb.mxu1 %v1138_v10 }
  0x77   : > { %742 = vmatpush.msrb.mxu3 %v1142_v12  ;;  %383 = vmatmul.f32.vlgmr.msra.gmra.mxu1 %v1216_v1 }
  0x78   : > { %731 = vmatpush.msrb.mxu2 %v1198_v54  ;;  %524 = vmatpush.msrb.mxu0 %v1206_v59 }
  0x79   : > { %562 = vmatpush.msrb.mxu1 %v1140_v11  ;;  %743 = vmatpush.msrb.mxu3 %v1146_v17  ;;  %v806_v11 = vld [vmem:[%s1375_s2] ss:$0 sm:$0xff] }
  0x7a   : > { %297 = vmatmul.f32.gmra.mxu0 %v296_v4  ;;  %732 = vmatpush.msrb.mxu2 %v1206_v59 }
  0x7b   : > { %528 = vmatpush.msrb.mxu0 %v1213_v0  ;;  %564 = vmatpush.msrb.mxu1 %v1142_v12 }
  0x7c   : > { %744 = vmatpush.msrb.mxu3 %v1158_v24  ;;  %440 = vmatmul.f32.gmra.mxu2 %v293_v39 }
  0x7d   : > { %733 = vmatpush.msrb.mxu2 %v1213_v0  ;;  %532 = vmatpush.msrb.mxu0 %v1221_v7 }
  0x7e   : > { %566 = vmatpush.msrb.mxu1 %v1146_v17  ;;  %745 = vmatpush.msrb.mxu3 %v1173_v34 }
  0x7f   : > { %482 = vmatmul.f32.gmra.mxu3 %v294_v26  ;;  %734 = vmatpush.msrb.mxu2 %v1221_v7 }
  0x80   : > { %536 = vmatpush.msrb.mxu0 %v1226_v14  ;;  %568 = vmatpush.msrb.mxu1 %v1158_v24 }
  0x81   : > { %746 = vmatpush.msrb.mxu3 %v1181_v41  ;;  %387 = vmatmul.f32.gmra.mxu1 %v1243_v33 }
  0x82   : > { %735 = vmatpush.msrb.mxu2 %v1226_v14  ;;  %540 = vmatpush.msrb.mxu0 %v1233_v20 }
  0x83   : > { %570 = vmatpush.msrb.mxu1 %v1173_v34  ;;  %747 = vmatpush.msrb.mxu3 %v1189_v47 }
  0x84   : > { %542 = vmatmul.f32.vlgmr.msrb.gmra.mxu0 %v1216_v1  ;;  %736 = vmatpush.msrb.mxu2 %v1233_v20 }
  0x85   : > { %572 = vmatpush.msrb.mxu1 %v1181_v41  ;;  %748 = vmatpush.msrb.mxu3 %v1196_v53 }
  0x86   : > { %546 = vmatmul.f32.vlgmr.msrb.gmra.mxu2 %v1243_v33 }
  0x87   : > { %574 = vmatpush.msrb.mxu1 %v1189_v47  ;;  %749 = vmatpush.msrb.mxu3 %v1204_v58 }
  0x88   : > { %584 = vmatmul.f32.vlgmr.msrb.gmra.mxu3 %v1243_v33 }
  0x89   : > { %576 = vmatpush.msrb.mxu1 %v1196_v53 }
  0x8b   : > { %578 = vmatpush.msrb.mxu1 %v1204_v58 }
  0x8c   : > { %580 = vmatmul.f32.vlgmr.msrb.gmra.mxu1 %v1216_v1 }
  0xeb   : > { %v290_v5 = vpop.f32.mrf.mxu0 }
  0xec   : > { %v291_v17 = vadd.f32 %v806_v11, %v290_v5 }
  0xf4   : > { %v384_v9 = vpop.f32.mrf.mxu1 }
  0xf5   : > { %v385_v27 = vadd.f32 %v384_v9, %v291_v17 }
  0xf6   : > { %v436_v10 = vpop.f32.mrf.mxu2 }
  0xf7   : > { %v298_v22 = vpop.f32.mrf.mxu0  ;;  %v437_v41 = vadd.f32 %v436_v10, %v385_v27 }
  0xf8   : > { %v477_v12 = vpop.f32.mrf.mxu3  ;;  %v299_v24 = vadd.f32 %v806_v11, %v298_v22 }
  0xf9   : > { %v478_v45 = vadd.f32 %v477_v12, %v437_v41 }
  0xfe   : > { %v388_v30 = vpop.f32.mrf.mxu1 }
  0xff   : > { %v441_v34 = vpop.f32.mrf.mxu2  ;;  %v389_v36 = vadd.f32 %v388_v30, %v299_v24 }
 0x101   : > { %v442_v43 = vadd.f32 %v441_v34, %v389_v36  ;;  %v543_v44 = vpop.f32.mrf.mxu0 }
 0x102   : > { %v483_v42 = vpop.f32.mrf.mxu3  ;;  %v544_v46 = vadd.f32 %v543_v44, %v478_v45 }
 0x103   : > { %v484_v47 = vadd.f32 %v483_v42, %v442_v43 }
 0x109   : > { %v547_v48 = vpop.f32.mrf.mxu2  ;;  %v581_v49 = vpop.f32.mrf.mxu1 }
 0x10a   : > { %v548_v50 = vadd.f32 %v547_v48, %v484_v47  ;;  %v582_v51 = vadd.f32 %v581_v49, %v544_v46 }
 0x10b   : > { %v585_v52 = vpop.f32.mrf.mxu3 }
 0x10c   : > { %807 = vtanh.f32 %v582_v51  ;;  %v586_v53 = vadd.f32 %v585_v52, %v548_v50 }
 0x10e   : > { %809 = vtanh.f32 %v586_v53 }
 0x111   : > { %599 = sbr.rel (!%p1044_p11) target bundleno = 309 (0x135), region = 44 }
 0x112   : > { %v808_v54 = vpop.eup %807 }
 0x113   : > { %590 = vst.msk [vmem:[%s214_s10] sm:$0xff] %vm244_vm1, %v808_v54 }
 0x114   : > { %v810_v55 = vpop.eup %809 }
 0x115   : > { %591 = vst.msk [vmem:[%s214_s10 + $0x8] sm:$0xff] %vm244_vm1, %v810_v55 }
 0x116   : > { %s1397_s5 = smov (!%p602_p6, %s601_s5), 2 }
 0x117   : > { %s715_s6 = sshll.u32 %s1397_s5, 3 }
 0x118   : > { %s605_s7 = ssub.s32 16, %s715_s6 }
 0x119   : > { %s606_s30 = sshll.u32 %s605_s7, 4 }
 0x11a   : > { %607 = vsyncadd %s593_s20, %s606_s30  ;;  %p1320_p13 = scmp.ne.s32.totalorder %s715_s6, 0  ;;  %s723_s24 = sshll.u32 %s1013_s16, 4 }
 0x11b   : > { %s610_s8 = scalar_lea.hbm %s1376_s3, %s723_s24  ;;  %s612_s11 = sshll.u32 %s214_s10, 4  ;;  %s1328_s11 = int_to_ptr.vmem [resolvable:$true] %s612_s11 }
 0x11c   : > { %s614_s27 = sshll.u32 %s610_s8, 4  ;;  %s719_s28 = sshll.u32 %s1397_s5, 7  ;;  %s1330_s27 = int_to_ptr.hbm [resolvable:$true] %s614_s27 }
 0x11d   : > { %s880_s29 = sshra.s32 %s1328_s11, 4  ;;  %s882_s23 = sshrl.u32 %s719_s28, 4  ;;  %s881_s29 = int_to_ptr.vmem [resolvable:$true] %s880_s29 }
 0x11e   : > { %s887_s26 = scalar_lea.vmem %s881_s29, %s882_s23  ;;  %s969_s16 = smov [#allocation7]  }
 0x11f   : > { %p888_p11 = scmp.ne.s32.totalorder %s881_s29, %s887_s26  ;;  %s891_s22 = scalar_lea.vmem %s969_s16, 32 }
 0x120   : > { %p893_p9 = scmp.lt.s32.totalorder %s891_s22, %s887_s26 }
 0x121   : > { %p889_p2 = pnand %p888_p11, %p1320_p13 }
 0x123   : > { %p890_p5 = pneg %p889_p2 }
 0x125   : > { %p895_p10 = pnand %p893_p9, %p890_p5 }
 0x127   : > { %898 = shalt.err (!%p895_p10)
}
 0x128   : > { %s899_s10 = sshra.s32 %s1330_s27, 4  ;;  %s910_s24 = scalar_lea.hbm %s1376_s3, 24  ;;  %s900_s10 = int_to_ptr.hbm [resolvable:$true] %s899_s10 }
 0x129   : > { %s906_s6 = scalar_lea.hbm %s900_s10, %s882_s23  ;;  %p911_p7 = scmp.lt.s32.totalorder %s900_s10, %s1376_s3 }
 0x12a   : > { %p907_p1 = scmp.ne.s32.totalorder %s900_s10, %s906_s6  ;;  %p912_p8 = scmp.lt.s32.totalorder %s910_s24, %s906_s6 }
 0x12c   : > { %p908_p0 = pnand %p907_p1, %p1320_p13  ;;  %p913_p4 = por %p912_p8, %p911_p7 }
 0x12e   : > { %p909_p3 = pneg %p908_p0 }
 0x130   : > { %p914_p12 = pnand %p913_p4, %p909_p3 }
 0x132   : > { %917 = shalt.err (!%p914_p12)
}
 0x133   : > { %s970_s8 = smov 128   ;;  %s971_s29 = smov 8  }
 0x134   : > { %620 = dma.vmem_to_hbm [thread:$0]  (%p1320_p13), %s1328_s11, %s719_s28, %s1330_s27, %s593_s20, %s970_s8, %s970_s8, %s971_s29  }
 0x135 PF: > { %s629_s23 = sand.u32 1, %s949_s12   ;;  %p1388_p6 = scmp.ne.s32.totalorder %s1382_s25, 0 }
 0x136   : > { %p1389_p11 = scmp.ge.s32.totalorder %s961_s15, 2  ;;  %s630_s26 = scalar_lea.sflag [#allocation4], %s629_s23 }
 0x138   : > { %p761_p2 = pnand %p1389_p11, %p1388_p6 }
 0x13a   : > { %p762_p5 = pneg %p761_p2 }
 0x13c   : > { %944 = dma.done.wait (%p762_p5), %s630_s26, 256  }
 0x13d   : > { %946 = vsyncadd (%p762_p5), %s630_s26, 4294967040  ;;  %p17_p9 = scmp.ge.s32.totalorder %s1017_s18, 4   ;;  %s1390_s12 = smov %s953_s13 }
 0x13e   : > { %s1391_s13 = smov %s957_s14  ;;  %s1392_s14 = smov %s1029_s21 }
 0x13f   : > { %s1393_s15 = smov %s1017_s18  ;;  %19 = sbr.rel (!%p17_p9) target bundleno = 6 (0x6), region = 81 }
 0x144   :  { %636 = vsyncpa [#allocation3], 1 }
 0x145   :  { %638 = vsyncpa [#allocation3 + $0x1], 1 }
 0x146   :  { %639 = vsyncpa [#allocation6], 1 }
 0x147   :  { %640 = vsyncpa [#allocation4], 1 }
 0x148   :  { %642 = vsyncpa [#allocation4 + $0x1], 1 }

</bundles_post_ra>
